<compile_context>
chip_gen: v7x
topology: tpu7x:2x2x1
jax: 0.10.0
libtpu: 0.0.40
codegen_flags: <defaults>
</compile_context>

<pallas_src>
import functools

import jax
import jax.numpy as jnp
import numpy as np
from jax import lax
from jax.experimental import pallas as pl
from jax.experimental.pallas import tpu as pltpu


# ----------------------------------------------------------------------------
# Kernel 1: tiled pairwise Euclidean distance matrix
#   dist[i, j] = sqrt(clamp(||x_i||^2 + ||x_j||^2 - 2 <x_i, x_j>, 1e-12))
# ----------------------------------------------------------------------------
def _dist_kernel(xr_ref, xt_ref, sqr_ref, sqc_ref, o_ref):
    xr = xr_ref[...]                                   # (TM, K)  f32
    xt = xt_ref[...]                                   # (K, TN)  f32 (pre-transposed)
    gram = lax.dot_general(xr, xt, (((1,), (0,)), ((), ())),
                           preferred_element_type=jnp.float32)   # (TM, TN) MXU
    d2 = sqr_ref[...] + sqc_ref[...] - 2.0 * gram      # (TM,1)+(1,TN) broadcast
    o_ref[...] = jnp.sqrt(jnp.maximum(d2, 1e-12))


def _vmem_budget_bytes():
    """~60% of this device generation's VMEM, with a conservative fallback."""
    try:
        cap = int(getattr(pltpu.get_tpu_info(), "vmem_capacity_bytes", 64 << 20))
    except Exception:                                  # pragma: no cover
        cap = 64 << 20                                 # v7x-sized fallback
    return int(cap * 0.6)


def euclidean_dist_pallas(x, max_tile=1024):
    """Pairwise Euclidean distances of the rows of x, (n, d) -> (n, n) f32."""
    x = jnp.asarray(x, jnp.float32)
    n, d = x.shape

    # Pad the contraction dim to a lane multiple so the MXU sees aligned K.
    d_pad = pl.cdiv(d, 128) * 128
    if d_pad != d:
        x = jnp.pad(x, ((0, 0), (0, d_pad - d)))
    sq = jnp.sum(x * x, axis=1)                        # (n,) f32, tiny XLA op

    budget = _vmem_budget_bytes()

    def bytes_needed(tm, tn):
        # double-buffered row tile + column tile + output tile, plus norms/slack
        return (2 * (tm * d_pad * 4 + d_pad * tn * 4 + tm * tn * 4)
                + 2 * (tm + tn) * 4 + (2 << 20))

    tile = max_tile
    while tile > 128 and bytes_needed(tile, tile) > budget:
        tile //= 2

    if n <= tile:
        tm = tn = n                                    # single full-array block
        npad = n
    else:
        tm = tn = tile
        npad = pl.cdiv(n, tile) * tile
    if npad != n:
        x = jnp.pad(x, ((0, npad - n), (0, 0)))
        sq = jnp.pad(sq, (0, npad - n))

    x_t = x.T                                          # (d_pad, npad) once, on device
    sq_row = sq.reshape(npad, 1)
    sq_col = sq.reshape(1, npad)

    vmem_limit = int(min(budget, max(bytes_needed(tm, tn), 32 << 20)))

    out = pl.pallas_call(
        _dist_kernel,
        out_shape=jax.ShapeDtypeStruct((npad, npad), jnp.float32),
        grid=(npad // tm, npad // tn),
        in_specs=[
            pl.BlockSpec((tm, d_pad), lambda i, j: (i, 0)),   # row tile of x
            pl.BlockSpec((d_pad, tn), lambda i, j: (0, j)),   # column tile of x^T
            pl.BlockSpec((tm, 1), lambda i, j: (i, 0)),       # ||x_i||^2
            pl.BlockSpec((1, tn), lambda i, j: (0, j)),       # ||x_j||^2
        ],
        out_specs=pl.BlockSpec((tm, tn), lambda i, j: (i, j)),
        compiler_params=pltpu.CompilerParams(
            dimension_semantics=("parallel", "parallel"),     # megacore sharding
            vmem_limit_bytes=vmem_limit,                      # sized to actual need
        ),
    )(x, x_t, sq_row, sq_col)
    return out[:n, :n]


# ----------------------------------------------------------------------------
# Kernel 2: per-row loss terms + total reduction (lane-dense layout).
#   pos_loss = 0.5  * mean_P    softplus(-2  * (margin - pos))
#   neg_loss = 0.05 * mean_keep softplus(20 * (margin - neg))
#   total    = sum over valid rows of (pos_loss + neg_loss)
# Margin arrives as an SMEM scalar, so one compiled kernel serves any margin.
# ----------------------------------------------------------------------------
def _softplus(z):
    # stable log(1 + exp(z)) = max(z, 0) + log(1 + exp(-|z|))
    return jnp.maximum(z, 0.0) + jnp.log(1.0 + jnp.exp(-jnp.abs(z)))


def _loss_kernel(margin_ref, pos_ref, neg_ref, keep_ref, valid_ref, o_ref):
    margin = margin_ref[0]                             # SMEM scalar
    pos = pos_ref[...]                                 # (P, N) lane-dense
    neg = neg_ref[...]                                 # (Q, N)
    keep = keep_ref[...]                               # (Q, N) 0/1
    valid = valid_ref[...]                             # (1, N) 0/1 (rows + pad)

    pos_loss = 0.5 * jnp.mean(_softplus(-2.0 * (margin - pos)),
                              axis=0, keepdims=True)   # (1, N)

    neg_sp = jnp.where(keep > 0.0, _softplus(20.0 * (margin - neg)), 0.0)
    cnt = jnp.sum(keep, axis=0, keepdims=True)         # (1, N)
    neg_loss = 0.05 * jnp.sum(neg_sp, axis=0, keepdims=True) / jnp.maximum(cnt, 1.0)

    o_ref[0] = jnp.sum((pos_loss + neg_loss) * valid)  # scalar -> SMEM


def loss_terms_pallas(pos_sel, neg_sel, neg_keep, row_valid, margin):
    """pos_sel (R,P), neg_sel/neg_keep (R,Q), row_valid (R,) -> (1,) loss sum."""
    r = pos_sel.shape[0]
    rpad = pl.cdiv(r, 128) * 128                       # rows on the lane axis

    def lane_dense(a):
        a = jnp.asarray(a, jnp.float32)
        if a.ndim == 1:
            a = a[:, None]
        a = a.T                                        # (width, R), on device
        return jnp.pad(a, ((0, 0), (0, rpad - r)))

    pos_t = lane_dense(pos_sel)                        # (P, rpad)
    neg_t = lane_dense(neg_sel)                        # (Q, rpad)
    keep_t = lane_dense(neg_keep)                      # (Q, rpad)
    valid_t = lane_dense(row_valid)                    # (1, rpad)
    margin_arr = jnp.full((1,), margin, jnp.float32)

    return pl.pallas_call(
        _loss_kernel,
        out_shape=jax.ShapeDtypeStruct((1,), jnp.float32),
        in_specs=[pl.BlockSpec(memory_space=pltpu.MemorySpace.SMEM)]
                 + [pl.BlockSpec(memory_space=pltpu.MemorySpace.VMEM)] * 4,
        out_specs=pl.BlockSpec(memory_space=pltpu.MemorySpace.SMEM),
    )(margin_arr, pos_t, neg_t, keep_t, valid_t)


# ----------------------------------------------------------------------------
# On-device per-row selection / sampling / statistics (replaces the host loop).
# Multinomial-without-replacement is realised as Gumbel top-k in log space
# (no exp overflow), matching the sampled-order semantics of torch.multinomial.
# ----------------------------------------------------------------------------
@functools.partial(jax.jit, static_argnames=("num_instances", "num_neg", "p_width"))
def _select_and_stats(dist_mat, targets, key, num_instances, num_neg, p_width):
    n = dist_mat.shape[0]
    same = targets[:, None] == targets[None, :]
    eye = jnp.eye(n, dtype=bool)
    pos_mask = same & ~eye
    neg_mask = ~same

    inf = jnp.float32(jnp.inf)
    pos_sorted = jnp.sort(jnp.where(pos_mask, dist_mat, inf),
                          axis=1)[:, : num_instances - 1]          # (n, m-1) asc
    neg_sorted = jnp.sort(jnp.where(neg_mask, dist_mat, inf),
                          axis=1)[:, :num_neg]                      # (n, Q)   asc

    pos_pair = pos_sorted[:, :p_width]                              # (n, P)

    # Gauss statistics of the (sorted) negative row; sampling weights in
    # log-space: log prob = (x - mu)^2 / (2 sigma^2)   (no exp -> no overflow)
    neg_mean = jnp.mean(neg_sorted, axis=1, keepdims=True)
    neg_var = jnp.mean((neg_sorted - neg_mean) ** 2, axis=1, keepdims=True)
    log_prob = (neg_sorted - neg_mean) ** 2 / jnp.maximum(2.0 * neg_var, 1e-12)

    k = num_instances - 1
    gumbel = jax.random.gumbel(key, neg_sorted.shape, dtype=jnp.float32)
    _, neg_index = lax.top_k(log_prob + gumbel, k)                  # sample order
    neg_pair = jnp.take_along_axis(neg_sorted, neg_index, axis=1)   # (n, k)

    keep = neg_pair < pos_pair[:, -1:] + 0.05                       # (n, k)
    valid = jnp.any(keep, axis=1)                                   # (n,)

    first_idx = jnp.argmax(keep, axis=1)                            # first kept (sample order)
    first_neg = jnp.take_along_axis(neg_pair, first_idx[:, None], axis=1)[:, 0]
    err = jnp.sum(jnp.logical_and(valid,
                                  pos_pair[:, 0] < first_neg - 0.1).astype(jnp.int32))

    pos_d = jnp.sum(jnp.where(pos_mask, dist_mat, 0.0)) / (n * (num_instances - 1))
    neg_d = jnp.sum(jnp.where(neg_mask, dist_mat, 0.0)) / (n * num_neg)

    return (pos_pair, neg_pair, keep.astype(jnp.float32),
            valid.astype(jnp.float32), err, pos_d, neg_d)


# ----------------------------------------------------------------------------
# Forward pass (module semantics).
# ----------------------------------------------------------------------------
def dist_weight_neighbour_loss(inputs, targets, margin=1.0, key=None):
    if key is None:
        key = jax.random.PRNGKey(42)
    inputs = jnp.asarray(inputs, jnp.float32)
    n = inputs.shape[0]

    # TODO(synk): like the torch masked_select+resize, this assumes balanced
    # classes; static shapes are derived once on host from the tiny label array.
    targets_np = np.asarray(jax.device_get(targets))
    total_pos = int((targets_np[:, None] == targets_np[None, :]).sum()) - n
    num_instances = total_pos // n + 1
    num_neg = n - num_instances
    p_width = min(3, num_instances - 1)
    assert num_instances >= 2, "each class needs at least 2 instances"

    dist_mat = euclidean_dist_pallas(inputs)           # Pallas hot path, stays on device

    # TODO(synk): torch.multinomial's sequential RNG stream has no JAX
    # equivalent; equivalent-in-distribution Gumbel top-k is used instead.
    targets_dev = jnp.asarray(targets_np)
    (pos_pair, neg_pair, keep, valid, err, pos_d, neg_d) = _select_and_stats(
        dist_mat, targets_dev, key,
        num_instances=num_instances, num_neg=num_neg, p_width=p_width)

    loss_sum = loss_terms_pallas(pos_pair, neg_pair, keep, valid, margin)
    loss = loss_sum[0] / n                             # == 0.0 when no valid rows

    loss, err, pos_d, neg_d = jax.device_get((loss, err, pos_d, neg_d))
    prec = 1.0 - float(err) / n
    return float(loss), float(prec), float(pos_d), float(neg_d)


if __name__ == "__main__":
    key = jax.random.PRNGKey(0)
    k_in, k_loss = jax.random.split(key)

    n, d = 8, 32
    inputs = jax.random.normal(k_in, (n, d), dtype=jnp.float32)
    targets = jnp.array([0, 0, 0, 0, 1, 1, 1, 1], dtype=jnp.int32)

    # warm + block on the distance kernel explicitly and sanity-check it
    dist = euclidean_dist_pallas(inputs)
    jax.block_until_ready(dist)
    ref = jnp.sqrt(jnp.maximum(
        jnp.sum((inputs[:, None, :] - inputs[None, :, :]) ** 2, axis=-1), 1e-12))
    off_diag = ~np.eye(n, dtype=bool)
    assert np.allclose(np.asarray(dist)[off_diag], np.asarray(ref)[off_diag],
                       rtol=1e-3, atol=1e-3)

    loss, prec, pos_d, neg_d = dist_weight_neighbour_loss(
        inputs, targets, margin=1.0, key=k_loss)

    assert np.isfinite(loss) and np.isfinite(pos_d) and np.isfinite(neg_d)
    assert 0.0 <= prec <= 1.0
    print("KERNEL_OK")
</pallas_src>

<mosaic_0001>
module attributes {stable_mosaic.version = 11 : i64} {
  func.func @_dist_kernel(%arg0: i32, %arg1: i32, %arg2: memref<8x128xf32, #tpu.memory_space<vmem>>, %arg3: memref<128x8xf32, #tpu.memory_space<vmem>>, %arg4: memref<8x1xf32, #tpu.memory_space<vmem>>, %arg5: memref<1x8xf32, #tpu.memory_space<vmem>>, %arg6: memref<8x8xf32, #tpu.memory_space<vmem>>) attributes {dimension_semantics = [#tpu.dimension_semantics<parallel>, #tpu.dimension_semantics<parallel>], iteration_bounds = array<i64: 1, 1>, scalar_prefetch = 0 : i64, scratch_operands = 0 : i64, tpu.core_type = #tpu.core_type<tc>, window_params = [{transform_indices = @transform_0, window_bounds = array<i64: 8, 128>}, {transform_indices = @transform_1, window_bounds = array<i64: 128, 8>}, {transform_indices = @transform_2, window_bounds = array<i64: 8, 1>}, {transform_indices = @transform_3, window_bounds = array<i64: 1, 8>}, {transform_indices = @transform_4, window_bounds = array<i64: 8, 8>}]} {
    %c0 = arith.constant 0 : index
    %c0_0 = arith.constant 0 : index
    %0 = vector.load %arg2[%c0, %c0_0] : memref<8x128xf32, #tpu.memory_space<vmem>>, vector<8x128xf32>
    %c0_1 = arith.constant 0 : index
    %c0_2 = arith.constant 0 : index
    %1 = vector.load %arg3[%c0_1, %c0_2] : memref<128x8xf32, #tpu.memory_space<vmem>>, vector<128x8xf32>
    %cst = arith.constant dense<0.000000e+00> : vector<8x8xf32>
    %2 = tpu.matmul %0, %1, %cst {dimension_numbers = #tpu.dot_dimension_numbers<[1], [0], [0], [1], [0, 0, 1, 1], [], []>} : vector<8x128xf32>, vector<128x8xf32>, vector<8x8xf32> -> vector<8x8xf32>
    %c0_3 = arith.constant 0 : index
    %c0_4 = arith.constant 0 : index
    %3 = vector.load %arg4[%c0_3, %c0_4] : memref<8x1xf32, #tpu.memory_space<vmem>>, vector<8x1xf32>
    %c0_5 = arith.constant 0 : index
    %c0_6 = arith.constant 0 : index
    %4 = vector.load %arg5[%c0_5, %c0_6] : memref<1x8xf32, #tpu.memory_space<vmem>>, vector<1x8xf32>
    %5 = vector.broadcast %3 : vector<8x1xf32> to vector<8x8xf32>
    %6 = vector.broadcast %4 : vector<1x8xf32> to vector<8x8xf32>
    %7 = arith.addf %5, %6 : vector<8x8xf32>
    %cst_7 = arith.constant 2.000000e+00 : f32
    %8 = vector.broadcast %cst_7 : f32 to vector<8x8xf32>
    %9 = arith.mulf %8, %2 : vector<8x8xf32>
    %10 = arith.subf %7, %9 : vector<8x8xf32>
    %cst_8 = arith.constant 9.99999996E-13 : f32
    %11 = vector.broadcast %cst_8 : f32 to vector<8x8xf32>
    %12 = arith.maximumf %10, %11 : vector<8x8xf32>
    %13 = math.sqrt %12 : vector<8x8xf32>
    %c0_9 = arith.constant 0 : index
    %c0_10 = arith.constant 0 : index
    %14 = vector.load %arg6[%c0_9, %c0_10] : memref<8x8xf32, #tpu.memory_space<vmem>>, vector<8x8xf32>
    tpu.vector_store %arg6[%c0_9, %c0_10], %13 {strides = array<i32>} : memref<8x8xf32, #tpu.memory_space<vmem>>, vector<8x8xf32>,
    return
  }
  func.func @transform_0(%arg0: i32, %arg1: i32) -> (i32, i32) {
    %c0_i32 = arith.constant 0 : i32
    %c0_i32_0 = arith.constant 0 : i32
    return %arg0, %c0_i32 : i32, i32
  }
  func.func @transform_1(%arg0: i32, %arg1: i32) -> (i32, i32) {
    %c0_i32 = arith.constant 0 : i32
    %c0_i32_0 = arith.constant 0 : i32
    return %c0_i32, %arg1 : i32, i32
  }
  func.func @transform_2(%arg0: i32, %arg1: i32) -> (i32, i32) {
    %c0_i32 = arith.constant 0 : i32
    %c0_i32_0 = arith.constant 0 : i32
    return %arg0, %c0_i32 : i32, i32
  }
  func.func @transform_3(%arg0: i32, %arg1: i32) -> (i32, i32) {
    %c0_i32 = arith.constant 0 : i32
    %c0_i32_0 = arith.constant 0 : i32
    return %c0_i32, %arg1 : i32, i32
  }
  func.func @transform_4(%arg0: i32, %arg1: i32) -> (i32, i32) {
    %c0_i32 = arith.constant 0 : i32
    return %arg0, %arg1 : i32, i32
  }
}

</mosaic_0001>

<bundles_post_ra>
// kernel: tpu_custom_call.1
= control target key start
LH: loop header
LB: loop body
LE: loop exit
PB: predicated region body
PF: predicated region fallthrough
CT: control target
= control target key end

     0   :  { %v254_v3 = vmov 0.0|0.0   ;;  %vm255_vm0 = vmmov 0   ;;  %v256_v6 = vmov 0.0   ;;  %v257_v7 = vmov 0   ;;  %s353_s0 = inlined_call_operand.vmem [shape: f32[8,128], index: 0, kind: input, shape index: {}]   ;;  %s354_s1 = inlined_call_operand.vmem [shape: f32[128,8], index: 1, kind: input, shape index: {}]   ;;  %s355_s2 = inlined_call_operand.vmem [shape: f32[8,1], index: 2, kind: input, shape index: {}]   ;;  %s356_s3 = inlined_call_operand.vmem [shape: f32[1,8], index: 3, kind: input, shape index: {}]   ;;  %s357_s4 = inlined_call_operand.hbm [shape: f32[8,8], index: 4, kind: output, shape index: {}]  }
   0x1   :  { %v19_v0 = vld [vmem:[%s354_s1] sm:$0xff]  ;;  %v20_v1 = vld [vmem:[%s354_s1 + $0x8] sm:$0xff]  ;;  %v21_v2 = vld [vmem:[%s354_s1 + $0x10] sm:$0xff]  ;;  %198 = vmatprep.subr.bf16.mxu0 %v254_v3  ;;  %195 = vmatprep.mubr.msk.f32.mxu0 %vm255_vm0, %v256_v6 }
   0x2   :  { %v199_v4 = vpack.c.bf16 %v20_v1, %v19_v0  ;;  %v22_v5 = vld [vmem:[%s354_s1 + $0x18] sm:$0xff]  ;;  %227 = vset.pattern.permute.xlu0 %v257_v7  ;;  %v23_v9 = vld [vmem:[%s354_s1 + $0x20] sm:$0xff]  ;;  %v24_v10 = vld [vmem:[%s354_s1 + $0x28] sm:$0xff] }
   0x3   :  { %v202_v8 = vpack.c.bf16 %v22_v5, %v21_v2  ;;  %v105_v11 = vld [vmem:[%s355_s2] sm:$0xff] }
   0x4   :  { %200 = vmatpush3.bf16.msra.mxu0 %v199_v4  ;;  %109 = vperm.xlu0 %227, %v105_v11  }
   0x5   :  { %201 = vmatprep.subr.bf16.mxu0 %v254_v3 }
   0x6   :  { %9 = vsyncpa [#allocation3], 0  ;;  %v205_v12 = vpack.c.bf16 %v24_v10, %v23_v9  ;;  %v25_v13 = vld [vmem:[%s354_s1 + $0x30] sm:$0xff]  ;;  %v26_v14 = vld [vmem:[%s354_s1 + $0x38] sm:$0xff]  ;;  %vm129_vm2 = vcmask 64512  }
   0x7   :  { %v208_v15 = vpack.c.bf16 %v26_v14, %v25_v13  ;;  %v27_v16 = vld [vmem:[%s354_s1 + $0x40] sm:$0xff]  ;;  %v28_v17 = vld [vmem:[%s354_s1 + $0x48] sm:$0xff]  ;;  %v29_v19 = vld [vmem:[%s354_s1 + $0x50] sm:$0xff] }
   0x8   :  { %203 = vmatpush3.bf16.msra.mxu0 %v202_v8  ;;  %v211_v18 = vpack.c.bf16 %v28_v17, %v27_v16  ;;  %v30_v20 = vld [vmem:[%s354_s1 + $0x58] sm:$0xff]  ;;  %v31_v22 = vld [vmem:[%s354_s1 + $0x60] sm:$0xff]  ;;  %v32_v23 = vld [vmem:[%s354_s1 + $0x68] sm:$0xff] }
   0x9   :  { %204 = vmatprep.subr.bf16.mxu0 %v254_v3  ;;  %v214_v21 = vpack.c.bf16 %v30_v20, %v29_v19  ;;  %v217_v24 = vpack.c.bf16 %v32_v23, %v31_v22  ;;  %v33_v25 = vld [vmem:[%s354_s1 + $0x70] sm:$0xff]  ;;  %v34_v26 = vld [vmem:[%s354_s1 + $0x78] sm:$0xff]  ;;  %v18_v28 = vld [vmem:[%s353_s0] sm:$0xff]  ;;  %s258_s1 = smov [#allocation2]  }
   0xa   :  { %v220_v27 = vpack.c.bf16 %v34_v26, %v33_v25  ;;  %v145_v29 = vld [vmem:[%s356_s3] ss:$0 sm:$0xff]  ;;  %s137_s26 = sshll.u32 %s258_s1, 4  ;;  %s138_s26 = int_to_ptr.vmem [resolvable:$true] %s137_s26 }
   0xb   :  { %s230_s0 = scalar_lea.vmem %s138_s26, 128  ;;  %p235_p1 = scmp.lt.s32.totalorder %s138_s26, %s138_s26 }
   0xc   :  { %206 = vmatpush3.bf16.msra.mxu0 %v205_v12  ;;  %p231_p0 = scmp.ne.s32.totalorder %s138_s26, %s230_s0  ;;  %p236_p2 = scmp.lt.s32.totalorder %s230_s0, %s230_s0 }
   0xd   :  { %207 = vmatprep.subr.bf16.mxu0 %v254_v3 }
   0xe   :  { %p237_p3 = por %p236_p2, %p235_p1 }
  0x10   :  { %209 = vmatpush3.bf16.msra.mxu0 %v208_v15  ;;  %p238_p4 = pnand %p237_p3, %p231_p0 }
  0x11   :  { %210 = vmatprep.subr.bf16.mxu0 %v254_v3 }
  0x14   :  { %212 = vmatpush3.bf16.msra.mxu0 %v211_v18 }
  0x15   :  { %213 = vmatprep.subr.bf16.mxu0 %v254_v3 }
  0x18   :  { %215 = vmatpush3.bf16.msra.mxu0 %v214_v21 }
  0x19   :  { %216 = vmatprep.subr.bf16.mxu0 %v254_v3 }
  0x1c   :  { %218 = vmatpush3.bf16.msra.mxu0 %v217_v24 }
  0x1d   :  { %219 = vmatprep.subr.bf16.mxu0 %v254_v3 }
  0x20   :  { %221 = vmatpush3.bf16.msra.mxu0 %v220_v27 }
  0x23   :  { %196 = vmatmul.mubr.f32.vlgmr.msra.gmra.mrb[0].mxu0 %v18_v28 }
  0x83   :  { %v110_v30 = vpop.permute.xlu0 %109 }
  0x84   :  { %v118_v31 = vadd.f32 %v145_v29, %v110_v30 }
  0xf6   :  { %v101_v32 = vpop.f32.mrb[0].mxu0 }
  0xf7   :  { %v119_v33 = vmul.f32 2.0, %v101_v32  ;;  %v197_v34 = vpop.f32.mrb[1].mxu0 }
  0xf9   :  { %v120_v35 = vsub.f32 %v118_v31, %v119_v33 }
  0xfb   :  { %v121_v36 = vmax.f32 %v120_v35, 1e-12 }
  0xfd   :  { %228 = vrsqrt.f32 %v121_v36  ;;  %vm124_vm1 = vcmp.eq.f32.partialorder %v121_v36, inf  ;;  %v127_v39 = vand.u32 2147483648, %v121_v36  ;;  %vm126_vm3 = vcmp.eq.f32.partialorder %v121_v36, 0.0 }
 0x107   :  { %v229_v37 = vpop.eup %228 }
 0x108   :  { %v123_v38 = vmul.f32 %v229_v37, %v121_v36 }
 0x10a   :  { %v125_v40 = vsel %vm124_vm1, %v121_v36, %v123_v38 }
 0x10b   :  { %v128_v41 = vsel %vm126_vm3, %v127_v39, %v125_v40 }
 0x10c   :  { %130 = vst.msk [vmem:[#allocation2] sm:$0xff] %vm129_vm2, %v128_v41 }
 0x10d   :  { %241 = shalt.err (!%p238_p4)
}
 0x10e   :  { %s242_s28 = scalar_lea.hbm %s357_s4, 128 }
 0x10f   :  { %p243_p5 = scmp.ne.s32.totalorder %s357_s4, %s242_s28  ;;  %p246_p6 = scmp.lt.u32.totalorder %s242_s28, %s357_s4 }
 0x111   :  { %p248_p7 = pnand %p246_p6, %p243_p5 }
 0x113   :  { %251 = shalt.err (!%p248_p7)
}
 0x114   :  { %140 = dma.vmem_to_hbm [thread:$0]  %s138_s26, 128, %s357_s4, [#allocation3]  }
 0x115   :  { %252 = dma.done.wait [#allocation3], 128  }
 0x116   :  { %253 = vsyncadd [#allocation3], 4294967168 }
 0x117   :  { %144 = vsyncpa [#allocation3], 1 }

</bundles_post_ra>
